<compile_context>
chip_gen: v5e
topology: v5e:2x2
jax: 0.10.0
libtpu: 0.0.40
codegen_flags: <defaults>
</compile_context>

<pallas_src>
import math

import jax
import jax.numpy as jnp
from jax.experimental import pallas as pl
from jax.experimental.pallas import tpu as pltpu

BN_EPS = 1e-5
LANE = 128      # pad hidden dims to full vreg lane width
SUBLANE = 8     # batch tile must be a multiple of the sublane count


def _round_up(n, m):
    return ((n + m - 1) // m) * m


# --------------------------------------------------------------------------
# Kernel: one batch tile per grid step; weights/biases are VMEM-resident.
# --------------------------------------------------------------------------
def binary_classifier_kernel(x_ref, w1_ref, b1_ref, w2_ref, b2_ref,
                             w3_ref, b3_ref, o_ref):
    x = x_ref[...]
    if x.dtype != jnp.bfloat16:          # no-op when the producer emits bf16
        x = x.astype(jnp.bfloat16)

    # --- block 1: Linear -> ReLU  (BN1 folded into W2/b2, Dropout = id) ---
    h1 = jnp.dot(x, w1_ref[...], preferred_element_type=jnp.float32)
    h1 = jnp.maximum(h1 + b1_ref[...], 0.0)                   # (TB, l1p) f32

    # --- block 2: Linear(BN1-folded) -> ReLU  (BN2 folded into w3/b3) ---
    h2 = jnp.dot(h1.astype(jnp.bfloat16), w2_ref[...],
                 preferred_element_type=jnp.float32)
    h2 = jnp.maximum(h2 + b2_ref[...], 0.0)                   # (TB, l2p) f32

    # --- head: Linear(l2,1) as VPU multiply + lane reduction (XLU slot) ---
    z = jnp.sum(h2 * w3_ref[...], axis=-1, keepdims=True) + b3_ref[0, 0]

    # Numerically stable sigmoid (exact divide; (TILE_B, 1) is tail work).
    ez = jnp.exp(-jnp.abs(z))                                 # in (0, 1]
    o_ref[...] = jnp.where(z >= 0.0, 1.0 / (1.0 + ez), ez / (1.0 + ez))
    # Dropout(0.3) is identity in eval mode.
    # TODO(synk): train-mode Dropout would need pltpu.prng_seed +
    # pltpu.stateful_bernoulli masking.
    # NOTE: (TILE_B, 1) output forces masked vst, but writeback is ~1/128 of
    # the x read traffic; a lane-dense output slab is not worth the transpose.


# --------------------------------------------------------------------------
# Wrapper: BN folding, weight lane padding, batch tiling, pallas_call.
# --------------------------------------------------------------------------
def binary_classifier_forward(x, params, *, tile_b=1024):
    """Fused MLP forward. x: (B, input_dim) -> (B, 1) float32."""
    B, D = x.shape
    l1 = params["w1"].shape[1]
    l2 = params["w2"].shape[1]

    # --- fold BatchNorm (eval) into the following Linear (tiny, f32) ---
    scale1 = params["g1"] * jax.lax.rsqrt(params["v1"] + BN_EPS)   # (1, l1)
    shift1 = params["be1"] - params["m1"] * scale1                 # (1, l1)
    w2f = scale1.reshape(-1, 1) * params["w2"]                     # (l1, l2)
    b2f = params["b2"] + shift1 @ params["w2"]                     # (1, l2)

    scale2 = params["g2"] * jax.lax.rsqrt(params["v2"] + BN_EPS)   # (1, l2)
    shift2 = params["be2"] - params["m2"] * scale2                 # (1, l2)
    w3f = (scale2.reshape(-1, 1) * params["w3"]).reshape(1, -1)    # (1, l2)
    b3f = (params["b3"] + shift2 @ params["w3"]).reshape(1, 1)     # (1, 1)

    # --- pad hidden dims to 128 lanes (weights only; x streams unpadded) ---
    l1p = _round_up(l1, LANE)
    l2p = _round_up(l2, LANE)

    def pad2(a, r, c):
        return jnp.pad(a, ((0, r - a.shape[0]), (0, c - a.shape[1])))

    w1_p = pad2(params["w1"], D, l1p).astype(jnp.bfloat16)   # K dim = D, unpadded
    b1_p = pad2(params["b1"], 1, l1p)
    w2_p = pad2(w2f, l1p, l2p).astype(jnp.bfloat16)
    b2_p = pad2(b2f, 1, l2p)
    w3_p = pad2(w3f, 1, l2p)

    # --- batch tiling: no padding/copy of x; ragged last block is masked ---
    TILE_B = min(tile_b, _round_up(B, SUBLANE))
    if B > SUBLANE:
        # Ensure >= 2 grid steps so ("parallel",) shards across both v7x TCs.
        TILE_B = min(TILE_B, _round_up(pl.cdiv(B, 2), SUBLANE))
    grid = (pl.cdiv(B, TILE_B),)

    flops = 2 * B * (D * l1p + l1p * l2p + l2p)
    bytes_accessed = (x.size * x.dtype.itemsize
                      + w1_p.size * 2 + w2_p.size * 2
                      + (b1_p.size + b2_p.size + w3_p.size + 1) * 4
                      + B * 4)

    out = pl.pallas_call(
        binary_classifier_kernel,
        out_shape=jax.ShapeDtypeStruct((B, 1), jnp.float32),
        grid=grid,
        in_specs=[
            # x: batch-tiled, feature dim full-extent (no lane padding, no
            # wrapper-side copy).  Add pipeline_mode=pl.Buffered(3) only if
            # profiling shows exposed x DMA at moderate tiles.
            pl.BlockSpec((TILE_B, D), lambda i: (i, 0)),
            pl.BlockSpec((D, l1p), lambda i: (0, 0)),       # W1: resident
            pl.BlockSpec((1, l1p), lambda i: (0, 0)),       # b1
            pl.BlockSpec((l1p, l2p), lambda i: (0, 0)),     # W2 (BN1 folded)
            pl.BlockSpec((1, l2p), lambda i: (0, 0)),       # b2 (BN1 folded)
            pl.BlockSpec((1, l2p), lambda i: (0, 0)),       # w3 row (BN2 folded)
            pl.BlockSpec(memory_space=pltpu.MemorySpace.SMEM),  # b3 scalar
        ],
        out_specs=pl.BlockSpec((TILE_B, 1), lambda i: (i, 0)),
        compiler_params=pltpu.CompilerParams(
            dimension_semantics=("parallel",),      # megacore-shard the batch
            vmem_limit_bytes=32 * 1024 * 1024,      # safe on v7x's 64 MiB VMEM
        ),
        cost_estimate=pl.CostEstimate(
            flops=flops, transcendentals=B, bytes_accessed=bytes_accessed),
    )(x, w1_p, b1_p, w2_p, b2_p, w3_p, b3f)

    return out


# --------------------------------------------------------------------------
# Params / reference
# --------------------------------------------------------------------------
def init_params(key, input_dim, l1, l2):
    """PyTorch-default init: uniform(-1/sqrt(fan_in), 1/sqrt(fan_in))."""
    def linear(key, fan_in, fan_out):
        kw, kb = jax.random.split(key)
        bound = 1.0 / math.sqrt(fan_in)
        w = jax.random.uniform(kw, (fan_in, fan_out), jnp.float32, -bound, bound)
        b = jax.random.uniform(kb, (1, fan_out), jnp.float32, -bound, bound)
        return w, b

    k1, k2, k3 = jax.random.split(key, 3)
    w1, b1 = linear(k1, input_dim, l1)
    w2, b2 = linear(k2, l1, l2)
    w3, b3 = linear(k3, l2, 1)

    def bn(n):
        return (jnp.ones((1, n), jnp.float32),    # gamma
                jnp.zeros((1, n), jnp.float32),   # beta
                jnp.zeros((1, n), jnp.float32),   # running_mean
                jnp.ones((1, n), jnp.float32))    # running_var

    g1, be1, m1, v1 = bn(l1)
    g2, be2, m2, v2 = bn(l2)
    return dict(w1=w1, b1=b1, g1=g1, be1=be1, m1=m1, v1=v1,
                w2=w2, b2=b2, g2=g2, be2=be2, m2=m2, v2=v2,
                w3=w3, b3=b3)


def reference_forward(x, p):
    """Pure-JAX f32 reference of the exact eval-mode PyTorch forward."""
    h1 = jnp.maximum(x @ p["w1"] + p["b1"], 0.0)
    h1 = (h1 - p["m1"]) * p["g1"] / jnp.sqrt(p["v1"] + BN_EPS) + p["be1"]
    h2 = jnp.maximum(h1 @ p["w2"] + p["b2"], 0.0)
    h2 = (h2 - p["m2"]) * p["g2"] / jnp.sqrt(p["v2"] + BN_EPS) + p["be2"]
    return jax.nn.sigmoid(h2 @ p["w3"] + p["b3"])


if __name__ == "__main__":
    key = jax.random.PRNGKey(0)
    k_param, k_x = jax.random.split(key)

    # Non-multiple batch exercises the ragged (masked) last tile; the
    # ceil(B/2) cap produces grid=(2,) so the megacore path is exercised too.
    batch, input_dim, l1, l2 = 13, 32, 64, 32
    params = init_params(k_param, input_dim, l1, l2)
    # Producer emits bf16 directly (halves the dominant HBM stream; no
    # standalone wrapper-side conversion pass).
    x = jax.random.normal(k_x, (batch, input_dim), jnp.bfloat16)

    out = binary_classifier_forward(x, params)
    out = jax.block_until_ready(out)

    ref = reference_forward(x.astype(jnp.float32), params)
    assert out.shape == (batch, 1)
    # bf16 MXU inputs: compare to the f32 reference loosely.
    assert jnp.allclose(out, ref, atol=2e-2, rtol=0.0), "mismatch vs reference"
    print("KERNEL_OK")
</pallas_src>

<mosaic_0001>
module attributes {stable_mosaic.version = 11 : i64} {
  func.func @binary_classifier_kernel(%arg0: i32, %arg1: memref<8x32xbf16, #tpu.memory_space<vmem>>, %arg2: memref<32x128xbf16, #tpu.memory_space<vmem>>, %arg3: memref<1x128xf32, #tpu.memory_space<vmem>>, %arg4: memref<128x128xbf16, #tpu.memory_space<vmem>>, %arg5: memref<1x128xf32, #tpu.memory_space<vmem>>, %arg6: memref<1x128xf32, #tpu.memory_space<vmem>>, %arg7: memref<1x1xf32, #tpu.memory_space<smem>>, %arg8: memref<8x1xf32, #tpu.memory_space<vmem>>) attributes {dimension_semantics = [#tpu.dimension_semantics<parallel>], iteration_bounds = array<i64: 2>, scalar_prefetch = 0 : i64, scratch_operands = 0 : i64, tpu.core_type = #tpu.core_type<tc>, window_params = [{transform_indices = @transform_0, window_bounds = array<i64: 8, 32>}, {pipeline_mode = #tpu.pipeline_mode<synchronous>, transform_indices = @transform_1, window_bounds = array<i64: 32, 128>}, {pipeline_mode = #tpu.pipeline_mode<synchronous>, transform_indices = @transform_2, window_bounds = array<i64: 1, 128>}, {pipeline_mode = #tpu.pipeline_mode<synchronous>, transform_indices = @transform_3, window_bounds = array<i64: 128, 128>}, {pipeline_mode = #tpu.pipeline_mode<synchronous>, transform_indices = @transform_4, window_bounds = array<i64: 1, 128>}, {pipeline_mode = #tpu.pipeline_mode<synchronous>, transform_indices = @transform_5, window_bounds = array<i64: 1, 128>}, {transform_indices = @transform_6, window_bounds = array<i64: 1, 1>}, {transform_indices = @transform_7, window_bounds = array<i64: 8, 1>}]} {
    %c0 = arith.constant 0 : index
    %c0_0 = arith.constant 0 : index
    %0 = vector.load %arg1[%c0, %c0_0] : memref<8x32xbf16, #tpu.memory_space<vmem>>, vector<8x32xbf16>
    %c0_1 = arith.constant 0 : index
    %c0_2 = arith.constant 0 : index
    %1 = vector.load %arg2[%c0_1, %c0_2] : memref<32x128xbf16, #tpu.memory_space<vmem>>, vector<32x128xbf16>
    %cst = arith.constant dense<0.000000e+00> : vector<8x128xf32>
    %2 = tpu.matmul %0, %1, %cst {dimension_numbers = #tpu.dot_dimension_numbers<[1], [0], [0], [1], [0, 0, 1, 1], [], []>} : vector<8x32xbf16>, vector<32x128xbf16>, vector<8x128xf32> -> vector<8x128xf32>
    %c0_3 = arith.constant 0 : index
    %c0_4 = arith.constant 0 : index
    %3 = vector.load %arg3[%c0_3, %c0_4] : memref<1x128xf32, #tpu.memory_space<vmem>>, vector<1x128xf32>
    %4 = vector.broadcast %3 : vector<1x128xf32> to vector<8x128xf32>
    %5 = arith.addf %2, %4 : vector<8x128xf32>
    %cst_5 = arith.constant 0.000000e+00 : f32
    %6 = vector.broadcast %cst_5 : f32 to vector<8x128xf32>
    %7 = arith.maximumf %5, %6 : vector<8x128xf32>
    %8 = arith.truncf %7 : vector<8x128xf32> to vector<8x128xbf16>
    %c0_6 = arith.constant 0 : index
    %c0_7 = arith.constant 0 : index
    %9 = vector.load %arg4[%c0_6, %c0_7] : memref<128x128xbf16, #tpu.memory_space<vmem>>, vector<128x128xbf16>
    %cst_8 = arith.constant dense<0.000000e+00> : vector<8x128xf32>
    %10 = tpu.matmul %8, %9, %cst_8 {dimension_numbers = #tpu.dot_dimension_numbers<[1], [0], [0], [1], [0, 0, 1, 1], [], []>} : vector<8x128xbf16>, vector<128x128xbf16>, vector<8x128xf32> -> vector<8x128xf32>
    %c0_9 = arith.constant 0 : index
    %c0_10 = arith.constant 0 : index
    %11 = vector.load %arg5[%c0_9, %c0_10] : memref<1x128xf32, #tpu.memory_space<vmem>>, vector<1x128xf32>
    %12 = vector.broadcast %11 : vector<1x128xf32> to vector<8x128xf32>
    %13 = arith.addf %10, %12 : vector<8x128xf32>
    %cst_11 = arith.constant 0.000000e+00 : f32
    %14 = vector.broadcast %cst_11 : f32 to vector<8x128xf32>
    %15 = arith.maximumf %13, %14 : vector<8x128xf32>
    %c0_12 = arith.constant 0 : index
    %c0_13 = arith.constant 0 : index
    %16 = vector.load %arg6[%c0_12, %c0_13] : memref<1x128xf32, #tpu.memory_space<vmem>>, vector<1x128xf32>
    %17 = vector.broadcast %16 : vector<1x128xf32> to vector<8x128xf32>
    %18 = arith.mulf %15, %17 : vector<8x128xf32>
    %cst_14 = arith.constant dense<0.000000e+00> : vector<8xf32>
    %19 = vector.multi_reduction <add>, %18, %cst_14 [1] : vector<8x128xf32> to vector<8xf32>
    %20 = vector.shape_cast %19 : vector<8xf32> to vector<8x1xf32>
    %c0_15 = arith.constant 0 : index
    %c0_16 = arith.constant 0 : index
    %21 = memref.load %arg7[%c0_15, %c0_16] : memref<1x1xf32, #tpu.memory_space<smem>>
    %22 = vector.broadcast %21 : f32 to vector<8x1xf32>
    %23 = arith.addf %20, %22 : vector<8x1xf32>
    %24 = math.absf %23 : vector<8x1xf32>
    %cst_17 = arith.constant 0.000000e+00 : f32
    %25 = vector.broadcast %cst_17 : f32 to vector<8x1xf32>
    %26 = arith.subf %25, %24 : vector<8x1xf32>
    %27 = math.exp %26 : vector<8x1xf32>
    %cst_18 = arith.constant 0.000000e+00 : f32
    %28 = vector.broadcast %cst_18 : f32 to vector<8x1xf32>
    %29 = arith.cmpf oge, %23, %28 : vector<8x1xf32>
    %cst_19 = arith.constant 1.000000e+00 : f32
    %30 = vector.broadcast %cst_19 : f32 to vector<8x1xf32>
    %31 = arith.addf %30, %27 : vector<8x1xf32>
    %cst_20 = arith.constant 1.000000e+00 : f32
    %32 = vector.broadcast %cst_20 : f32 to vector<8x1xf32>
    %33 = arith.divf %32, %31 : vector<8x1xf32>
    %cst_21 = arith.constant 1.000000e+00 : f32
    %34 = vector.broadcast %cst_21 : f32 to vector<8x1xf32>
    %35 = arith.addf %34, %27 : vector<8x1xf32>
    %36 = arith.divf %27, %35 : vector<8x1xf32>
    %37 = arith.select %29, %33, %36 : vector<8x1xi1>, vector<8x1xf32>
    %c0_22 = arith.constant 0 : index
    %c0_23 = arith.constant 0 : index
    %38 = vector.load %arg8[%c0_22, %c0_23] : memref<8x1xf32, #tpu.memory_space<vmem>>, vector<8x1xf32>
    tpu.vector_store %arg8[%c0_22, %c0_23], %37 {strides = array<i32>} : memref<8x1xf32, #tpu.memory_space<vmem>>, vector<8x1xf32>,
    return
  }
  func.func @transform_0(%arg0: i32) -> (i32, i32) {
    %c0_i32 = arith.constant 0 : i32
    %c0_i32_0 = arith.constant 0 : i32
    return %arg0, %c0_i32 : i32, i32
  }
  func.func @transform_1(%arg0: i32) -> (i32, i32) {
    %c0_i32 = arith.constant 0 : i32
    %c0_i32_0 = arith.constant 0 : i32
    %c0_i32_1 = arith.constant 0 : i32
    return %c0_i32, %c0_i32_0 : i32, i32
  }
  func.func @transform_2(%arg0: i32) -> (i32, i32) {
    %c0_i32 = arith.constant 0 : i32
    %c0_i32_0 = arith.constant 0 : i32
    %c0_i32_1 = arith.constant 0 : i32
    return %c0_i32, %c0_i32_0 : i32, i32
  }
  func.func @transform_3(%arg0: i32) -> (i32, i32) {
    %c0_i32 = arith.constant 0 : i32
    %c0_i32_0 = arith.constant 0 : i32
    %c0_i32_1 = arith.constant 0 : i32
    return %c0_i32, %c0_i32_0 : i32, i32
  }
  func.func @transform_4(%arg0: i32) -> (i32, i32) {
    %c0_i32 = arith.constant 0 : i32
    %c0_i32_0 = arith.constant 0 : i32
    %c0_i32_1 = arith.constant 0 : i32
    return %c0_i32, %c0_i32_0 : i32, i32
  }
  func.func @transform_5(%arg0: i32) -> (i32, i32) {
    %c0_i32 = arith.constant 0 : i32
    %c0_i32_0 = arith.constant 0 : i32
    %c0_i32_1 = arith.constant 0 : i32
    return %c0_i32, %c0_i32_0 : i32, i32
  }
  func.func @transform_6(%arg0: i32) -> (i32, i32) {
    %c0_i32 = arith.constant 0 : i32
    %c0_i32_0 = arith.constant 0 : i32
    %c0_i32_1 = arith.constant 0 : i32
    return %c0_i32, %c0_i32_0 : i32, i32
  }
  func.func @transform_7(%arg0: i32) -> (i32, i32) {
    %c0_i32 = arith.constant 0 : i32
    %c0_i32_0 = arith.constant 0 : i32
    return %arg0, %c0_i32 : i32, i32
  }
}

</mosaic_0001>

<bundles_post_ra>
// kernel: tpu_custom_call.1
= control target key start
LH: loop header
LB: loop body
LE: loop exit
PB: predicated region body
PF: predicated region fallthrough
CT: control target
= control target key end

     0   :  { %s1001_s0 = inlined_call_operand.hbm [shape: bf16[13,32], index: 0, kind: input, shape index: {}]   ;;  %s1002_s1 = inlined_call_operand.hbm [shape: bf16[32,128], index: 1, kind: input, shape index: {}]   ;;  %s1003_s2 = inlined_call_operand.vmem [shape: f32[1,128], index: 2, kind: input, shape index: {}]   ;;  %s1004_s3 = inlined_call_operand.hbm [shape: bf16[128,128], index: 3, kind: input, shape index: {}]   ;;  %s1005_s4 = inlined_call_operand.vmem [shape: f32[1,128], index: 4, kind: input, shape index: {}]   ;;  %s1006_s5 = inlined_call_operand.vmem [shape: f32[1,128], index: 5, kind: input, shape index: {}]   ;;  %s1007_s6 = inlined_call_operand.<no memory space> [shape: f32[1,1], index: 6, kind: input, shape index: {}]   ;;  %s1008_s7 = inlined_call_operand.vmem [shape: f32[13,1], index: 7, kind: output, shape index: {}]  }
   0x1   :  { %12 = sst [smem:[#allocation2]] %s1007_s6 }
   0x2   :  { %13 = vsyncpa [#allocation4], 0 }
   0x3   :  { %15 = vsyncpa [#allocation4 + $0x1], 0 }
   0x4   :  { %16 = vsyncpa [#allocation6], 0  ;;  %s883_s26 = smov 0   ;;  %s885_s27 = smov 0  }
   0x5   :  { %s887_s28 = smov 0   ;;  %s889_s29 = smov 0  }
   0x6 LB: > { %s216_s8 = sshll.u32 %s1002_s1, 4  ;;  %s907_s9 = sadd.s32 4294967295, %s834_s29   ;;  %s834_s29 = sphi %s889_s29, %s1015_s29   ;;  %s830_s28 = sphi %s887_s28, %s1014_s28   ;;  %s826_s27 = sphi %s885_s27, %s1013_s27   ;;  %s822_s26 = sphi %s883_s26, %s1012_s26   ;;  %s217_s8 = int_to_ptr.hbm [resolvable:$true] %s216_s8 }
   0x7   : > { %p573_p0 = scmp.ge.s32.totalorder %s834_s29, 1  ;;  %p43_p1 = scmp.eq.s32.totalorder %s907_s9, 0 }
   0x8   : > { %p205_p2 = scmp.lt.s32.totalorder %s834_s29, 3  ;;  %s836_s11 = smov [#allocation5]  }
   0x9   : > { %s218_s12 = sshll.u32 %s836_s11, 4  ;;  %s233_s15 = sshll.u32 %s1004_s3, 4  ;;  %s219_s12 = int_to_ptr.vmem [resolvable:$true] %s218_s12  ;;  %s234_s15 = int_to_ptr.hbm [resolvable:$true] %s233_s15 }
   0xa   : > { %p912_p3 = pnand %p573_p0, %p205_p2  ;;  %s837_s16 = smov [#allocation7]  }
   0xb   : > { %s235_s17 = sshll.u32 %s837_s16, 4  ;;  %s838_s18 = smov 64   ;;  %s236_s17 = int_to_ptr.vmem [resolvable:$true] %s235_s17 }
   0xc   : > { %p647_p4 = pneg %p912_p3  ;;  %s839_s19 = smov 4  }
   0xd   : > { %s924_s20 = sadd.s32 1, %s834_s29   ;;  %s29_s22 = sadd.s32 1, %s830_s28 }
   0xe   : > { %p648_p5 = pnand %p647_p4, %p43_p1  ;;  %s26_s21 = ssub.s32 %s834_s29, %s924_s20 }
   0xf   : > { %p27_p6 = scmp.eq.s32.totalorder %s26_s21, 0  ;;  %p36_p7 = scmp.ne.s32.totalorder %s830_s28, %s826_s27 }
  0x10   : > { %650 = dma.hbm_to_vmem [thread:$0]  (!%p648_p5), %s217_s8, 256, %s219_s12, [#allocation6], %s838_s18, %s838_s18, %s839_s19  }
  0x11   : > { %653 = dma.hbm_to_vmem [thread:$0]  (!%p648_p5), %s234_s15, 1024, %s236_s17, [#allocation6], %s838_s18, %s838_s18, %s839_s19  }
  0x12   : > { %p37_p8 = scmp.eq.s32.totalorder %s834_s29, 0  ;;  %p42_p9 = scmp.ne.s32.totalorder %s826_s27, %s822_s26 }
  0x13   : > { %s935_s23 = scalar_select %p27_p6, %s830_s28, %s29_s22  }
  0x14   : > { %p939_p10 = por %p43_p1, %p42_p9  ;;  %p660_p11 = scmp.lt.s32.totalorder %s834_s29, 2 }
  0x15   : > { %s258_s25 = sand.u32 1, %s830_s28   ;;  %s578_s6 = sshll.u32 %s834_s29, 2 }
  0x16   : > { %p38_p12 = por %p37_p8, %p36_p7  ;;  %s577_s30 = sshll.u32 %s258_s25, 2 }
  0x17   : > { %s266_s12 = scalar_lea.hbm %s1001_s0, %s578_s6  ;;  %s262_s14 = scalar_lea.vmem [#allocation3], %s577_s30 }
  0x18   : > { %s268_s13 = sshll.u32 %s266_s12, 4  ;;  %s270_s15 = sshll.u32 %s262_s14, 4  ;;  %s269_s13 = int_to_ptr.hbm [resolvable:$true] %s268_s13  ;;  %s271_s15 = int_to_ptr.vmem [resolvable:$true] %s270_s15 }
  0x19   : > { %p949_p13 = pnand %p660_p11, %p38_p12  ;;  %s259_s16 = scalar_lea.sflag [#allocation4], %s258_s25 }
  0x1a   : > { %s766_s17 = sshra.s32 %s269_s13, 4  ;;  %s773_s21 = scalar_lea.hbm %s1001_s0, 8  ;;  %s767_s17 = int_to_ptr.hbm [resolvable:$true] %s766_s17 }
  0x1b   : > { %s768_s29 = scalar_lea.hbm %s767_s17, 4  ;;  %p770_p2 = pneg %p949_p13 }
  0x1c   : > { %p769_p0 = scmp.ne.s32.totalorder %s767_s17, %s768_s29  ;;  %p774_p6 = scmp.lt.s32.totalorder %s767_s17, %s1001_s0 }
  0x1d   : > { %p775_p7 = scmp.lt.s32.totalorder %s773_s21, %s768_s29 }
  0x1e   : > { %p771_p4 = pnand %p770_p2, %p769_p0 }
  0x1f   : > { %p776_p8 = por %p775_p7, %p774_p6 }
  0x20   : > { %p772_p5 = pneg %p771_p4 }
  0x22   : > { %p777_p9 = pnand %p776_p8, %p772_p5 }
  0x24   : > { %780 = shalt.err (!%p777_p9)
}
  0x25   : > { %657 = dma.hbm_to_vmem [thread:$0]  (!%p949_p13), %s269_s13, 64, %s271_s15, %s259_s16  }
  0x26   : > { %279 = sbr.rel (%p912_p3) target bundleno = 472 (0x1d8), region = 48  ;;  %s281_s25 = sand.u32 (!%p912_p3), 1, %s826_s27  }
  0x27   : > { %s580_s30 = sshll.u32 (!%p912_p3), %s281_s25, 2  ;;  %s282_s8 = scalar_lea.sflag (!%p912_p3), [#allocation4], %s281_s25 }
  0x28   : > { %s285_s11 = scalar_lea.vmem (!%p912_p3), [#allocation3], %s580_s30 }
  0x2b   : > { %813 = dma.done.wait (%p939_p10), %s282_s8, 64  }
  0x2c   : > { %815 = vsyncadd (%p939_p10), %s282_s8, 4294967232 }
  0x2d   : > { %817 = dma.done.wait (%p43_p1), [#allocation6], 1280  }
  0x2e   : > { %819 = vsyncadd (%p43_p1), [#allocation6], 4294966016  ;;  %v628_v0 = vld [vmem:[#allocation5 + $0x8] sm:$0xff]  ;;  %v627_v2 = vld [vmem:[#allocation5] sm:$0xff]  ;;  %vm352_vm0 = vcmask 261120   ;;  %s460_s26 = sld [smem:[#allocation2]] }
  0x2f   : > { %v636_v1 = vld [vmem:[#allocation7 + $0x38] sm:$0xff]  ;;  %362 = vmatpush.bf16.msra.mxu0 %v628_v0  ;;  %v635_v3 = vld [vmem:[#allocation7 + $0x30] sm:$0xff]  ;;  %v331_v4 = vld [vmem:[%s285_s11] sm:$0xf]  ;;  %p326_p1 = scmp.lt.s32.totalorder %s907_s9, 1  ;;  %vm486_vm5 = vcmask 7168  }
  0x30   : > { %439 = vmatpush.bf16.msra.mxu1 %v636_v1  ;;  %v634_v5 = vld [vmem:[#allocation7 + $0x28] sm:$0xff]  ;;  %v633_v6 = vld [vmem:[#allocation7 + $0x20] sm:$0xff]  ;;  %v632_v7 = vld [vmem:[#allocation7 + $0x18] sm:$0xff] }
  0x31   : > { %v631_v8 = vld [vmem:[#allocation7 + $0x10] sm:$0xff]  ;;  %v630_v9 = vld [vmem:[#allocation7 + $0x8] sm:$0xff]  ;;  %v629_v10 = vld [vmem:[#allocation7] sm:$0xff]  ;;  %s1017_s9 = smov (!%p326_p1, %s907_s9), 1 }
  0x32   : > { %v699_v11 = vld [vmem:[%s1003_s2] ss:$0 sm:$0xff]  ;;  %s583_s16 = sshll.u32 %s1017_s9, 3 }
  0x33   : > { %363 = vmatpush.bf16.msra.mxu0 %v627_v2  ;;  %v700_v17 = vld [vmem:[%s1005_s4] ss:$0 sm:$0xff]  ;;  %s329_s18 = scalar_lea.vmem %s1008_s7, %s583_s16 }
  0x34   : > { %440 = vmatpush.bf16.msra.mxu1 %v635_v3  ;;  %v701_v20 = vld [vmem:[%s1006_s5] ss:$0 sm:$0xff]  ;;  %v461_v24 = vstv %s460_s26 }
  0x36   : > { %592 = vmatmul.msk.bf16.vlgmr.msra.gmra.mxu0 %vm352_vm0, %v331_v4 }
  0x38   : > { %441 = vmatpush.bf16.msra.mxu1 %v634_v5 }
  0x3c   : > { %442 = vmatpush.bf16.msra.mxu1 %v633_v6 }
  0x40   : > { %443 = vmatpush.bf16.msra.mxu1 %v632_v7 }
  0x44   : > { %444 = vmatpush.bf16.msra.mxu1 %v631_v8 }
  0x48   : > { %445 = vmatpush.bf16.msra.mxu1 %v630_v9 }
  0x4c   : > { %446 = vmatpush.bf16.msra.mxu1 %v629_v10 }
  0xb3   : > { %v365_v12 = vpop.f32.mrf.mxu0 }
  0xb4   : > { %v366_v13 = vadd.f32 %v699_v11, %v365_v12 }
  0xb6   : > { %v369_v14 = vmax.f32 %v366_v13, 0.0 }
  0xb8   : > { %v370_v15 = vpack.c.bf16 %v369_v14, %v369_v14 }
  0xba   : > { %447 = vmatmul.bf16.vlgmr.msra.gmra.mxu1 %v370_v15 }
  0xbb   : > { %v367_v16 = vpop.f32.mrf.mxu0 }
 0x137   : > { %v448_v18 = vpop.f32.mrf.mxu1 }
 0x138   : > { %v449_v19 = vadd.f32 %v700_v17, %v448_v18 }
 0x13a   : > { %v452_v21 = vmax.f32 %v449_v19, 0.0 }
 0x13c   : > { %v457_v22 = vmul.f32 %v701_v20, %v452_v21 }
 0x13e   : > { %458 = vadd.xlane.f32.xlu0 %v457_v22 }
 0x13f   : > { %v450_v23 = vpop.f32.mrf.mxu1 }
 0x1b1   : > { %v459_v25 = vpop.xlane.xlu0 %458 }
 0x1b2   : > { %v462_v26 = vadd.f32 %v461_v24, %v459_v25 }
 0x1b4   : > { %v463_v27 = vand.u32 2147483647, %v462_v26  ;;  %vm467_vm6 = vcmp.ge.f32.partialorder %v462_v26, 0.0 }
 0x1b6   : > { %v464_v28 = vsub.f32 0.0, %v463_v27 }
 0x1b8   : > { %v465_v29 = vmul.f32 1.442695, %v464_v28 }
 0x1ba   : > { %702 = vpow2.f32 %v465_v29 }
 0x1c0   : > { %v703_v30 = vpop.eup %702 }
 0x1c1   : > { %v468_v31 = vadd.f32 1.0, %v703_v30 }
 0x1c3   : > { %704 = vrcp.f32 %v468_v31  ;;  %v480_v35 = vand.u32 2147483648, %v468_v31  ;;  %v478_v37 = vand.u32 2147483647, %v468_v31  ;;  %vm474_vm2 = vweird.f32 %v468_v31 }
 0x1c5   : > { %v481_v39 = vor.u32 1.1754944e-38, %v480_v35  ;;  %vm479_vm4 = vcmp.eq.f32.partialorder %v478_v37, 8.507059e+37 }
 0x1c9   : > { %v705_v32 = vpop.eup %704 }
 0x1ca   : > { %v470_v33 = vmul.f32 %v705_v32, %v468_v31  ;;  %vm475_vm1 = vweird.f32 %v705_v32 }
 0x1cb   : > { %vm476_vm3 = vmor %vm474_vm2, %vm475_vm1 }
 0x1cc   : > { %v471_v34 = vsub.f32 1.0, %v470_v33 }
 0x1ce   : > { %v472_v36 = vmul.f32 %v705_v32, %v471_v34 }
 0x1d0   : > { %v473_v38 = vadd.f32 %v705_v32, %v472_v36 }
 0x1d2   : > { %v477_v40 = vsel %vm476_vm3, %v705_v32, %v473_v38 }
 0x1d3   : > { %v482_v41 = vsel %vm479_vm4, %v481_v39, %v477_v40 }
 0x1d4   : > { %v484_v42 = vmul.f32 %v703_v30, %v482_v41 }
 0x1d6   : > { %v485_v43 = vsel %vm467_vm6, %v482_v41, %v484_v42 }
 0x1d7   : > { %487 = vst.msk [vmem:[%s329_s18] sm:$0xff] %vm486_vm5, %v485_v43 }
 0x1d8 PF: > { %p19_p3 = scmp.ge.s32.totalorder %s924_s20, 4   ;;  %s1012_s26 = smov %s826_s27 }
 0x1d9   : > { %s1013_s27 = smov %s830_s28  ;;  %s1014_s28 = smov %s935_s23 }
 0x1da   : > { %s1015_s29 = smov %s924_s20  ;;  %21 = sbr.rel (!%p19_p3) target bundleno = 6 (0x6), region = 96 }
 0x1df   :  { %507 = vsyncpa [#allocation4], 1 }
 0x1e0   :  { %509 = vsyncpa [#allocation4 + $0x1], 1 }
 0x1e1   :  { %510 = vsyncpa [#allocation6], 1 }

</bundles_post_ra>
